<compile_context>
chip_gen: v7x
topology: tpu7x:2x2x1
jax: 0.10.0
libtpu: 0.0.40
codegen_flags: <defaults>
</compile_context>

<pallas_src>
import functools

import jax
import jax.numpy as jnp
from jax.experimental import pallas as pl
from jax.experimental.pallas import tpu as pltpu


LANE_PAD = 128            # lane-dense width for the epilogue / output slab
DEFAULT_BATCH_TILE = 512  # batch rows per grid step (kept a multiple of 8)


def _round_up(x, m):
    return ((x + m - 1) // m) * m


def lstm_pose_kernel(x_ref, wih_ref, whh_ref, w3_ref, b3_ref, w4_ref, b4_ref,
                     out_ref, *, hidden_dim, seq_len, num_classes):
    """One batch tile.

    x_ref: (T, Bt, F+1) time-major f32; the last input column is the constant 1
           that folds the combined LSTM bias into the input projection.
    LSTM weight gate columns are in order [i | f | o | g].
    out_ref: (Bt, 128) lane-padded log-softmax; wrapper slices to num_classes.
    """
    H = hidden_dim
    T = seq_len
    _, Bt, F = x_ref.shape

    # Hoisted input projection: one MXU matmul covers all T timesteps; bias is
    # folded in via the ones column / extra wih row.  Bt % 8 == 0 so the
    # (T, Bt, F) -> (T*Bt, F) reshape is a pure tile relabel.
    x = x_ref[...].reshape(T * Bt, F)
    gates_x = jnp.dot(x, wih_ref[...],
                      preferred_element_type=jnp.float32)        # (T*Bt, 4H)
    whh = whh_ref[...]                                            # (H, 4H)

    # Peeled t = 0: h0 = c0 = 0, so the recurrent matmul and f*c term vanish.
    g0 = gates_x[0:Bt]
    sig0 = jax.nn.sigmoid(g0[:, :3 * H])          # [i | f | o] in one EUP pass
    gg0 = jnp.tanh(g0[:, 3 * H:])                 # g
    c = sig0[:, :H] * gg0
    h = sig0[:, 2 * H:3 * H] * jnp.tanh(c)

    # Remaining T-1 steps, fully unrolled (T is small and static); all slices
    # are 8-sublane aligned because Bt is a multiple of 8.
    # TODO(synk): stage whh in MXU weight registers (pltpu.matmul_push_rhs /
    # matmul_acc_lhs / matmul_pop) to drop the 7 redundant RHS pushes from the
    # serial critical path once validated on all target chips.
    for t in range(1, T):
        gates = gates_x[t * Bt:(t + 1) * Bt] + jnp.dot(
            h, whh, preferred_element_type=jnp.float32)
        sig = jax.nn.sigmoid(gates[:, :3 * H])
        gg = jnp.tanh(gates[:, 3 * H:])
        c = sig[:, H:2 * H] * c + sig[:, :H] * gg
        h = sig[:, 2 * H:3 * H] * jnp.tanh(c)

    # fc3 -> LeakyReLU(0.01) -> fc4 (lane-padded to 128) -> masked LogSoftmax.
    out = jnp.dot(h, w3_ref[...],
                  preferred_element_type=jnp.float32) + b3_ref[...]   # (Bt, 128)
    out = jnp.maximum(out, 0.01 * out)            # LeakyReLU, single vmax
    logits = jnp.dot(out, w4_ref[...],
                     preferred_element_type=jnp.float32) + b4_ref[...]  # (Bt, 128)

    lane = jax.lax.broadcasted_iota(jnp.int32, logits.shape, 1)
    valid = lane < num_classes
    logits = jnp.where(valid, logits, -1e30)      # kill padded lanes
    m = jnp.max(logits, axis=1, keepdims=True)
    z = logits - m
    se = jnp.sum(jnp.where(valid, jnp.exp(z), 0.0), axis=1, keepdims=True)
    out_ref[...] = z - jnp.log(se)                # sublane/lane-dense store


def init_params(key, hidden_dim, num_classes, input_size=20, fc_mid=128):
    """Deterministic init mimicking PyTorch's uniform(-1/sqrt(fan_in), ...).

    Weights stored pre-transposed to (in_features, out_features); LSTM gate
    columns in PyTorch order (i, f, g, o)."""
    ks = jax.random.split(key, 8)
    H = hidden_dim

    def u(k, shape, bound):
        return jax.random.uniform(k, shape, jnp.float32, -bound, bound)

    b_lstm = 1.0 / jnp.sqrt(H)
    b_fc3 = 1.0 / jnp.sqrt(H)
    b_fc4 = 1.0 / jnp.sqrt(fc_mid)

    return {
        'wih': u(ks[0], (input_size, 4 * H), b_lstm),
        'whh': u(ks[1], (H, 4 * H), b_lstm),
        'bih': u(ks[2], (1, 4 * H), b_lstm),
        'bhh': u(ks[3], (1, 4 * H), b_lstm),
        'w3': u(ks[4], (H, fc_mid), b_fc3),
        'b3': u(ks[5], (1, fc_mid), b_fc3),
        'w4': u(ks[6], (fc_mid, num_classes), b_fc4),
        'b4': u(ks[7], (1, num_classes), b_fc4),
    }


def prepare_params(params, hidden_dim, lane_pad=LANE_PAD):
    """One-time transform for the kernel:
       * reorder LSTM gate columns (i,f,g,o) -> (i,f,o,g)
       * fold bih + bhh into an extra wih row (paired with a ones column in x)
       * zero-pad fc4 to `lane_pad` output lanes (lane-dense epilogue)."""
    H = hidden_dim

    def reorder(w):  # column blocks [i,f,g,o] -> [i,f,o,g] along last axis
        return jnp.concatenate(
            [w[..., :2 * H], w[..., 3 * H:4 * H], w[..., 2 * H:3 * H]], axis=-1)

    bias = reorder(params['bih'] + params['bhh'])                 # (1, 4H)
    wih_aug = jnp.concatenate([reorder(params['wih']), bias], axis=0)  # (F+1, 4H)

    c = params['w4'].shape[1]
    pad = lane_pad - c
    return {
        'wih_aug': wih_aug,
        'whh': reorder(params['whh']),
        'w3': params['w3'],
        'b3': params['b3'],
        'w4p': jnp.pad(params['w4'], ((0, 0), (0, pad))),
        'b4p': jnp.pad(params['b4'], ((0, 0), (0, pad))),
    }


def lstm_nn_pose_forward(x, prep, *, seq_len, hidden_dim, num_classes,
                         batch_tile=DEFAULT_BATCH_TILE, lane_pad=LANE_PAD):
    """x: (N, 20) float32, N = current_batch * seq_len.
    Returns (log_probs (current_batch, num_classes), current_batch)."""
    N, feat = x.shape
    assert N % seq_len == 0, "number of rows must be divisible by seq_len"
    current_batch = N // seq_len
    F_aug = feat + 1
    H = hidden_dim

    # Batch tile: multiple of 8 (sublane aligned), capped by batch_tile.
    bt = min(_round_up(batch_tile, 8), _round_up(current_batch, 8))
    b_pad = _round_up(current_batch, bt)
    n_tiles = b_pad // bt

    xb = x.reshape(current_batch, seq_len, feat)
    ones = jnp.ones((current_batch, seq_len, 1), x.dtype)
    xa = jnp.concatenate([xb, ones], axis=-1)                 # bias-fold column
    if b_pad != current_batch:
        xa = jnp.pad(xa, ((0, b_pad - current_batch), (0, 0), (0, 0)))
    xt = jnp.transpose(xa, (1, 0, 2))                          # (T, B_pad, F+1)

    kernel = functools.partial(lstm_pose_kernel, hidden_dim=hidden_dim,
                               seq_len=seq_len, num_classes=num_classes)
    y_pad = pl.pallas_call(
        kernel,
        out_shape=jax.ShapeDtypeStruct((b_pad, lane_pad), jnp.float32),
        grid=(n_tiles,),
        in_specs=[
            # x: time-major batch tile, pipelined across the grid.
            pl.BlockSpec((seq_len, bt, F_aug), lambda i: (0, i, 0)),
            # Weights: full arrays, constant index_map -> resident across tiles.
            pl.BlockSpec((F_aug, 4 * H), lambda i: (0, 0)),
            pl.BlockSpec((H, 4 * H), lambda i: (0, 0)),
            pl.BlockSpec((H, 128), lambda i: (0, 0)),
            pl.BlockSpec((1, 128), lambda i: (0, 0)),
            pl.BlockSpec((128, lane_pad), lambda i: (0, 0)),
            pl.BlockSpec((1, lane_pad), lambda i: (0, 0)),
        ],
        out_specs=pl.BlockSpec((bt, lane_pad), lambda i: (i, 0)),
        compiler_params=pltpu.CompilerParams(
            dimension_semantics=("parallel",)),   # megacore shard on v7x
    )(xt, prep['wih_aug'], prep['whh'], prep['w3'], prep['b3'],
      prep['w4p'], prep['b4p'])

    # Padded lanes (>= num_classes) and padded batch rows carry garbage by
    # construction -> this slice is mandatory for any consumer.
    return y_pad[:current_batch, :num_classes], current_batch


def reference_forward(x, params, *, seq_len, hidden_dim, num_classes):
    """Pure-JAX reference with the original PyTorch (i,f,g,o) gate order."""
    N, feat = x.shape
    B = N // seq_len
    H = hidden_dim
    hp = jax.lax.Precision.HIGHEST
    xb = x.reshape(B, seq_len, feat)
    h = jnp.zeros((B, H), jnp.float32)
    c = jnp.zeros((B, H), jnp.float32)
    bias = params['bih'] + params['bhh']
    for t in range(seq_len):
        gates = (jnp.dot(xb[:, t, :], params['wih'], precision=hp)
                 + jnp.dot(h, params['whh'], precision=hp) + bias)
        i = jax.nn.sigmoid(gates[:, 0 * H:1 * H])
        f = jax.nn.sigmoid(gates[:, 1 * H:2 * H])
        g = jnp.tanh(gates[:, 2 * H:3 * H])
        o = jax.nn.sigmoid(gates[:, 3 * H:4 * H])
        c = f * c + i * g
        h = o * jnp.tanh(c)
    out = jnp.dot(h, params['w3'], precision=hp) + params['b3']
    out = jnp.where(out > 0, out, 0.01 * out)
    out = jnp.dot(out, params['w4'], precision=hp) + params['b4']
    return jax.nn.log_softmax(out, axis=1)


if __name__ == "__main__":
    hidden_dim = 32
    seq_len = 8
    num_classes = 6
    input_size = 20

    key = jax.random.PRNGKey(0)
    k_params, k_x1, k_x2 = jax.random.split(key, 3)

    params = init_params(k_params, hidden_dim, num_classes, input_size=input_size)
    prep = prepare_params(params, hidden_dim)   # one-time weight transform

    # --- primary case: module's flattened (batch*seq_len, 20) input ---------
    current_batch = 2
    x = jax.random.normal(k_x1, (current_batch * seq_len, input_size), jnp.float32)
    y_pred, cb = lstm_nn_pose_forward(
        x, prep, seq_len=seq_len, hidden_dim=hidden_dim, num_classes=num_classes)
    y_pred = jax.block_until_ready(y_pred)

    assert y_pred.shape == (current_batch, num_classes)
    assert cb == current_batch
    # Rows of log-softmax exponentiate-sum to ~1.
    assert jnp.allclose(jnp.sum(jnp.exp(y_pred), axis=1), 1.0, atol=1e-4)
    # Guard the gate reorder / bias fold / lane padding numerics against a
    # pure-JAX reference in the original PyTorch gate order.
    y_ref = reference_forward(x, params, seq_len=seq_len,
                              hidden_dim=hidden_dim, num_classes=num_classes)
    assert jnp.allclose(y_pred, y_ref, atol=1e-3, rtol=1e-3)

    # --- multi-tile case: exercises the batch grid, padding, and pipelining --
    big_batch = 50
    x2 = jax.random.normal(k_x2, (big_batch * seq_len, input_size), jnp.float32)
    y2, cb2 = lstm_nn_pose_forward(
        x2, prep, seq_len=seq_len, hidden_dim=hidden_dim,
        num_classes=num_classes, batch_tile=16)         # -> grid of 4 tiles
    y2 = jax.block_until_ready(y2)
    assert y2.shape == (big_batch, num_classes)
    assert cb2 == big_batch
    y2_ref = reference_forward(x2, params, seq_len=seq_len,
                               hidden_dim=hidden_dim, num_classes=num_classes)
    assert jnp.allclose(y2, y2_ref, atol=1e-3, rtol=1e-3)

    print("KERNEL_OK")
</pallas_src>

<mosaic_0001>
module attributes {stable_mosaic.version = 11 : i64} {
  func.func @lstm_pose_kernel(%arg0: i32, %arg1: memref<8x8x21xf32, #tpu.memory_space<vmem>>, %arg2: memref<21x128xf32, #tpu.memory_space<vmem>>, %arg3: memref<32x128xf32, #tpu.memory_space<vmem>>, %arg4: memref<32x128xf32, #tpu.memory_space<vmem>>, %arg5: memref<1x128xf32, #tpu.memory_space<vmem>>, %arg6: memref<128x128xf32, #tpu.memory_space<vmem>>, %arg7: memref<1x128xf32, #tpu.memory_space<vmem>>, %arg8: memref<8x128xf32, #tpu.memory_space<vmem>>) attributes {dimension_semantics = [#tpu.dimension_semantics<parallel>], iteration_bounds = array<i64: 1>, scalar_prefetch = 0 : i64, scratch_operands = 0 : i64, tpu.core_type = #tpu.core_type<tc>, window_params = [{transform_indices = @transform_0, window_bounds = array<i64: 8, 8, 21>}, {pipeline_mode = #tpu.pipeline_mode<synchronous>, transform_indices = @transform_1, window_bounds = array<i64: 21, 128>}, {pipeline_mode = #tpu.pipeline_mode<synchronous>, transform_indices = @transform_2, window_bounds = array<i64: 32, 128>}, {pipeline_mode = #tpu.pipeline_mode<synchronous>, transform_indices = @transform_3, window_bounds = array<i64: 32, 128>}, {pipeline_mode = #tpu.pipeline_mode<synchronous>, transform_indices = @transform_4, window_bounds = array<i64: 1, 128>}, {pipeline_mode = #tpu.pipeline_mode<synchronous>, transform_indices = @transform_5, window_bounds = array<i64: 128, 128>}, {pipeline_mode = #tpu.pipeline_mode<synchronous>, transform_indices = @transform_6, window_bounds = array<i64: 1, 128>}, {transform_indices = @transform_7, window_bounds = array<i64: 8, 128>}]} {
    %c0 = arith.constant 0 : index
    %c0_0 = arith.constant 0 : index
    %c0_1 = arith.constant 0 : index
    %0 = vector.load %arg1[%c0, %c0_0, %c0_1] : memref<8x8x21xf32, #tpu.memory_space<vmem>>, vector<8x8x21xf32>
    %1 = vector.shape_cast %0 : vector<8x8x21xf32> to vector<64x21xf32>
    %c0_2 = arith.constant 0 : index
    %c0_3 = arith.constant 0 : index
    %2 = vector.load %arg2[%c0_2, %c0_3] : memref<21x128xf32, #tpu.memory_space<vmem>>, vector<21x128xf32>
    %cst = arith.constant dense<0.000000e+00> : vector<64x128xf32>
    %3 = tpu.matmul %1, %2, %cst {dimension_numbers = #tpu.dot_dimension_numbers<[1], [0], [0], [1], [0, 0, 1, 1], [], []>} : vector<64x21xf32>, vector<21x128xf32>, vector<64x128xf32> -> vector<64x128xf32>
    %c0_4 = arith.constant 0 : index
    %c0_5 = arith.constant 0 : index
    %4 = vector.load %arg3[%c0_4, %c0_5] : memref<32x128xf32, #tpu.memory_space<vmem>>, vector<32x128xf32>
    %5 = vector.extract_strided_slice %3 {offsets = [0, 0], sizes = [8, 128], strides = [1, 1]} : vector<64x128xf32> to vector<8x128xf32>
    %6 = vector.extract_strided_slice %5 {offsets = [0, 0], sizes = [8, 96], strides = [1, 1]} : vector<8x128xf32> to vector<8x96xf32>
    %7 = arith.negf %6 : vector<8x96xf32>
    %8 = math.exp %7 : vector<8x96xf32>
    %cst_6 = arith.constant 1.000000e+00 : f32
    %9 = vector.broadcast %cst_6 : f32 to vector<8x96xf32>
    %10 = arith.addf %9, %8 : vector<8x96xf32>
    %11 = arith.divf %9, %10 : vector<8x96xf32>
    %12 = vector.extract_strided_slice %5 {offsets = [0, 96], sizes = [8, 32], strides = [1, 1]} : vector<8x128xf32> to vector<8x32xf32>
    %13 = math.tanh %12 : vector<8x32xf32>
    %14 = vector.extract_strided_slice %11 {offsets = [0, 0], sizes = [8, 32], strides = [1, 1]} : vector<8x96xf32> to vector<8x32xf32>
    %15 = arith.mulf %14, %13 : vector<8x32xf32>
    %16 = vector.extract_strided_slice %11 {offsets = [0, 64], sizes = [8, 32], strides = [1, 1]} : vector<8x96xf32> to vector<8x32xf32>
    %17 = math.tanh %15 : vector<8x32xf32>
    %18 = arith.mulf %16, %17 : vector<8x32xf32>
    %19 = vector.extract_strided_slice %3 {offsets = [8, 0], sizes = [8, 128], strides = [1, 1]} : vector<64x128xf32> to vector<8x128xf32>
    %cst_7 = arith.constant dense<0.000000e+00> : vector<8x128xf32>
    %20 = tpu.matmul %18, %4, %cst_7 {dimension_numbers = #tpu.dot_dimension_numbers<[1], [0], [0], [1], [0, 0, 1, 1], [], []>} : vector<8x32xf32>, vector<32x128xf32>, vector<8x128xf32> -> vector<8x128xf32>
    %21 = arith.addf %19, %20 : vector<8x128xf32>
    %22 = vector.extract_strided_slice %21 {offsets = [0, 0], sizes = [8, 96], strides = [1, 1]} : vector<8x128xf32> to vector<8x96xf32>
    %23 = arith.negf %22 : vector<8x96xf32>
    %24 = math.exp %23 : vector<8x96xf32>
    %cst_8 = arith.constant 1.000000e+00 : f32
    %25 = vector.broadcast %cst_8 : f32 to vector<8x96xf32>
    %26 = arith.addf %25, %24 : vector<8x96xf32>
    %27 = arith.divf %25, %26 : vector<8x96xf32>
    %28 = vector.extract_strided_slice %21 {offsets = [0, 96], sizes = [8, 32], strides = [1, 1]} : vector<8x128xf32> to vector<8x32xf32>
    %29 = math.tanh %28 : vector<8x32xf32>
    %30 = vector.extract_strided_slice %27 {offsets = [0, 32], sizes = [8, 32], strides = [1, 1]} : vector<8x96xf32> to vector<8x32xf32>
    %31 = arith.mulf %30, %15 : vector<8x32xf32>
    %32 = vector.extract_strided_slice %27 {offsets = [0, 0], sizes = [8, 32], strides = [1, 1]} : vector<8x96xf32> to vector<8x32xf32>
    %33 = arith.mulf %32, %29 : vector<8x32xf32>
    %34 = arith.addf %31, %33 : vector<8x32xf32>
    %35 = vector.extract_strided_slice %27 {offsets = [0, 64], sizes = [8, 32], strides = [1, 1]} : vector<8x96xf32> to vector<8x32xf32>
    %36 = math.tanh %34 : vector<8x32xf32>
    %37 = arith.mulf %35, %36 : vector<8x32xf32>
    %38 = vector.extract_strided_slice %3 {offsets = [16, 0], sizes = [8, 128], strides = [1, 1]} : vector<64x128xf32> to vector<8x128xf32>
    %cst_9 = arith.constant dense<0.000000e+00> : vector<8x128xf32>
    %39 = tpu.matmul %37, %4, %cst_9 {dimension_numbers = #tpu.dot_dimension_numbers<[1], [0], [0], [1], [0, 0, 1, 1], [], []>} : vector<8x32xf32>, vector<32x128xf32>, vector<8x128xf32> -> vector<8x128xf32>
    %40 = arith.addf %38, %39 : vector<8x128xf32>
    %41 = vector.extract_strided_slice %40 {offsets = [0, 0], sizes = [8, 96], strides = [1, 1]} : vector<8x128xf32> to vector<8x96xf32>
    %42 = arith.negf %41 : vector<8x96xf32>
    %43 = math.exp %42 : vector<8x96xf32>
    %cst_10 = arith.constant 1.000000e+00 : f32
    %44 = vector.broadcast %cst_10 : f32 to vector<8x96xf32>
    %45 = arith.addf %44, %43 : vector<8x96xf32>
    %46 = arith.divf %44, %45 : vector<8x96xf32>
    %47 = vector.extract_strided_slice %40 {offsets = [0, 96], sizes = [8, 32], strides = [1, 1]} : vector<8x128xf32> to vector<8x32xf32>
    %48 = math.tanh %47 : vector<8x32xf32>
    %49 = vector.extract_strided_slice %46 {offsets = [0, 32], sizes = [8, 32], strides = [1, 1]} : vector<8x96xf32> to vector<8x32xf32>
    %50 = arith.mulf %49, %34 : vector<8x32xf32>
    %51 = vector.extract_strided_slice %46 {offsets = [0, 0], sizes = [8, 32], strides = [1, 1]} : vector<8x96xf32> to vector<8x32xf32>
    %52 = arith.mulf %51, %48 : vector<8x32xf32>
    %53 = arith.addf %50, %52 : vector<8x32xf32>
    %54 = vector.extract_strided_slice %46 {offsets = [0, 64], sizes = [8, 32], strides = [1, 1]} : vector<8x96xf32> to vector<8x32xf32>
    %55 = math.tanh %53 : vector<8x32xf32>
    %56 = arith.mulf %54, %55 : vector<8x32xf32>
    %57 = vector.extract_strided_slice %3 {offsets = [24, 0], sizes = [8, 128], strides = [1, 1]} : vector<64x128xf32> to vector<8x128xf32>
    %cst_11 = arith.constant dense<0.000000e+00> : vector<8x128xf32>
    %58 = tpu.matmul %56, %4, %cst_11 {dimension_numbers = #tpu.dot_dimension_numbers<[1], [0], [0], [1], [0, 0, 1, 1], [], []>} : vector<8x32xf32>, vector<32x128xf32>, vector<8x128xf32> -> vector<8x128xf32>
    %59 = arith.addf %57, %58 : vector<8x128xf32>
    %60 = vector.extract_strided_slice %59 {offsets = [0, 0], sizes = [8, 96], strides = [1, 1]} : vector<8x128xf32> to vector<8x96xf32>
    %61 = arith.negf %60 : vector<8x96xf32>
    %62 = math.exp %61 : vector<8x96xf32>
    %cst_12 = arith.constant 1.000000e+00 : f32
    %63 = vector.broadcast %cst_12 : f32 to vector<8x96xf32>
    %64 = arith.addf %63, %62 : vector<8x96xf32>
    %65 = arith.divf %63, %64 : vector<8x96xf32>
    %66 = vector.extract_strided_slice %59 {offsets = [0, 96], sizes = [8, 32], strides = [1, 1]} : vector<8x128xf32> to vector<8x32xf32>
    %67 = math.tanh %66 : vector<8x32xf32>
    %68 = vector.extract_strided_slice %65 {offsets = [0, 32], sizes = [8, 32], strides = [1, 1]} : vector<8x96xf32> to vector<8x32xf32>
    %69 = arith.mulf %68, %53 : vector<8x32xf32>
    %70 = vector.extract_strided_slice %65 {offsets = [0, 0], sizes = [8, 32], strides = [1, 1]} : vector<8x96xf32> to vector<8x32xf32>
    %71 = arith.mulf %70, %67 : vector<8x32xf32>
    %72 = arith.addf %69, %71 : vector<8x32xf32>
    %73 = vector.extract_strided_slice %65 {offsets = [0, 64], sizes = [8, 32], strides = [1, 1]} : vector<8x96xf32> to vector<8x32xf32>
    %74 = math.tanh %72 : vector<8x32xf32>
    %75 = arith.mulf %73, %74 : vector<8x32xf32>
    %76 = vector.extract_strided_slice %3 {offsets = [32, 0], sizes = [8, 128], strides = [1, 1]} : vector<64x128xf32> to vector<8x128xf32>
    %cst_13 = arith.constant dense<0.000000e+00> : vector<8x128xf32>
    %77 = tpu.matmul %75, %4, %cst_13 {dimension_numbers = #tpu.dot_dimension_numbers<[1], [0], [0], [1], [0, 0, 1, 1], [], []>} : vector<8x32xf32>, vector<32x128xf32>, vector<8x128xf32> -> vector<8x128xf32>
    %78 = arith.addf %76, %77 : vector<8x128xf32>
    %79 = vector.extract_strided_slice %78 {offsets = [0, 0], sizes = [8, 96], strides = [1, 1]} : vector<8x128xf32> to vector<8x96xf32>
    %80 = arith.negf %79 : vector<8x96xf32>
    %81 = math.exp %80 : vector<8x96xf32>
    %cst_14 = arith.constant 1.000000e+00 : f32
    %82 = vector.broadcast %cst_14 : f32 to vector<8x96xf32>
    %83 = arith.addf %82, %81 : vector<8x96xf32>
    %84 = arith.divf %82, %83 : vector<8x96xf32>
    %85 = vector.extract_strided_slice %78 {offsets = [0, 96], sizes = [8, 32], strides = [1, 1]} : vector<8x128xf32> to vector<8x32xf32>
    %86 = math.tanh %85 : vector<8x32xf32>
    %87 = vector.extract_strided_slice %84 {offsets = [0, 32], sizes = [8, 32], strides = [1, 1]} : vector<8x96xf32> to vector<8x32xf32>
    %88 = arith.mulf %87, %72 : vector<8x32xf32>
    %89 = vector.extract_strided_slice %84 {offsets = [0, 0], sizes = [8, 32], strides = [1, 1]} : vector<8x96xf32> to vector<8x32xf32>
    %90 = arith.mulf %89, %86 : vector<8x32xf32>
    %91 = arith.addf %88, %90 : vector<8x32xf32>
    %92 = vector.extract_strided_slice %84 {offsets = [0, 64], sizes = [8, 32], strides = [1, 1]} : vector<8x96xf32> to vector<8x32xf32>
    %93 = math.tanh %91 : vector<8x32xf32>
    %94 = arith.mulf %92, %93 : vector<8x32xf32>
    %95 = vector.extract_strided_slice %3 {offsets = [40, 0], sizes = [8, 128], strides = [1, 1]} : vector<64x128xf32> to vector<8x128xf32>
    %cst_15 = arith.constant dense<0.000000e+00> : vector<8x128xf32>
    %96 = tpu.matmul %94, %4, %cst_15 {dimension_numbers = #tpu.dot_dimension_numbers<[1], [0], [0], [1], [0, 0, 1, 1], [], []>} : vector<8x32xf32>, vector<32x128xf32>, vector<8x128xf32> -> vector<8x128xf32>
    %97 = arith.addf %95, %96 : vector<8x128xf32>
    %98 = vector.extract_strided_slice %97 {offsets = [0, 0], sizes = [8, 96], strides = [1, 1]} : vector<8x128xf32> to vector<8x96xf32>
    %99 = arith.negf %98 : vector<8x96xf32>
    %100 = math.exp %99 : vector<8x96xf32>
    %cst_16 = arith.constant 1.000000e+00 : f32
    %101 = vector.broadcast %cst_16 : f32 to vector<8x96xf32>
    %102 = arith.addf %101, %100 : vector<8x96xf32>
    %103 = arith.divf %101, %102 : vector<8x96xf32>
    %104 = vector.extract_strided_slice %97 {offsets = [0, 96], sizes = [8, 32], strides = [1, 1]} : vector<8x128xf32> to vector<8x32xf32>
    %105 = math.tanh %104 : vector<8x32xf32>
    %106 = vector.extract_strided_slice %103 {offsets = [0, 32], sizes = [8, 32], strides = [1, 1]} : vector<8x96xf32> to vector<8x32xf32>
    %107 = arith.mulf %106, %91 : vector<8x32xf32>
    %108 = vector.extract_strided_slice %103 {offsets = [0, 0], sizes = [8, 32], strides = [1, 1]} : vector<8x96xf32> to vector<8x32xf32>
    %109 = arith.mulf %108, %105 : vector<8x32xf32>
    %110 = arith.addf %107, %109 : vector<8x32xf32>
    %111 = vector.extract_strided_slice %103 {offsets = [0, 64], sizes = [8, 32], strides = [1, 1]} : vector<8x96xf32> to vector<8x32xf32>
    %112 = math.tanh %110 : vector<8x32xf32>
    %113 = arith.mulf %111, %112 : vector<8x32xf32>
    %114 = vector.extract_strided_slice %3 {offsets = [48, 0], sizes = [8, 128], strides = [1, 1]} : vector<64x128xf32> to vector<8x128xf32>
    %cst_17 = arith.constant dense<0.000000e+00> : vector<8x128xf32>
    %115 = tpu.matmul %113, %4, %cst_17 {dimension_numbers = #tpu.dot_dimension_numbers<[1], [0], [0], [1], [0, 0, 1, 1], [], []>} : vector<8x32xf32>, vector<32x128xf32>, vector<8x128xf32> -> vector<8x128xf32>
    %116 = arith.addf %114, %115 : vector<8x128xf32>
    %117 = vector.extract_strided_slice %116 {offsets = [0, 0], sizes = [8, 96], strides = [1, 1]} : vector<8x128xf32> to vector<8x96xf32>
    %118 = arith.negf %117 : vector<8x96xf32>
    %119 = math.exp %118 : vector<8x96xf32>
    %cst_18 = arith.constant 1.000000e+00 : f32
    %120 = vector.broadcast %cst_18 : f32 to vector<8x96xf32>
    %121 = arith.addf %120, %119 : vector<8x96xf32>
    %122 = arith.divf %120, %121 : vector<8x96xf32>
    %123 = vector.extract_strided_slice %116 {offsets = [0, 96], sizes = [8, 32], strides = [1, 1]} : vector<8x128xf32> to vector<8x32xf32>
    %124 = math.tanh %123 : vector<8x32xf32>
    %125 = vector.extract_strided_slice %122 {offsets = [0, 32], sizes = [8, 32], strides = [1, 1]} : vector<8x96xf32> to vector<8x32xf32>
    %126 = arith.mulf %125, %110 : vector<8x32xf32>
    %127 = vector.extract_strided_slice %122 {offsets = [0, 0], sizes = [8, 32], strides = [1, 1]} : vector<8x96xf32> to vector<8x32xf32>
    %128 = arith.mulf %127, %124 : vector<8x32xf32>
    %129 = arith.addf %126, %128 : vector<8x32xf32>
    %130 = vector.extract_strided_slice %122 {offsets = [0, 64], sizes = [8, 32], strides = [1, 1]} : vector<8x96xf32> to vector<8x32xf32>
    %131 = math.tanh %129 : vector<8x32xf32>
    %132 = arith.mulf %130, %131 : vector<8x32xf32>
    %133 = vector.extract_strided_slice %3 {offsets = [56, 0], sizes = [8, 128], strides = [1, 1]} : vector<64x128xf32> to vector<8x128xf32>
    %cst_19 = arith.constant dense<0.000000e+00> : vector<8x128xf32>
    %134 = tpu.matmul %132, %4, %cst_19 {dimension_numbers = #tpu.dot_dimension_numbers<[1], [0], [0], [1], [0, 0, 1, 1], [], []>} : vector<8x32xf32>, vector<32x128xf32>, vector<8x128xf32> -> vector<8x128xf32>
    %135 = arith.addf %133, %134 : vector<8x128xf32>
    %136 = vector.extract_strided_slice %135 {offsets = [0, 0], sizes = [8, 96], strides = [1, 1]} : vector<8x128xf32> to vector<8x96xf32>
    %137 = arith.negf %136 : vector<8x96xf32>
    %138 = math.exp %137 : vector<8x96xf32>
    %cst_20 = arith.constant 1.000000e+00 : f32
    %139 = vector.broadcast %cst_20 : f32 to vector<8x96xf32>
    %140 = arith.addf %139, %138 : vector<8x96xf32>
    %141 = arith.divf %139, %140 : vector<8x96xf32>
    %142 = vector.extract_strided_slice %135 {offsets = [0, 96], sizes = [8, 32], strides = [1, 1]} : vector<8x128xf32> to vector<8x32xf32>
    %143 = math.tanh %142 : vector<8x32xf32>
    %144 = vector.extract_strided_slice %141 {offsets = [0, 32], sizes = [8, 32], strides = [1, 1]} : vector<8x96xf32> to vector<8x32xf32>
    %145 = arith.mulf %144, %129 : vector<8x32xf32>
    %146 = vector.extract_strided_slice %141 {offsets = [0, 0], sizes = [8, 32], strides = [1, 1]} : vector<8x96xf32> to vector<8x32xf32>
    %147 = arith.mulf %146, %143 : vector<8x32xf32>
    %148 = arith.addf %145, %147 : vector<8x32xf32>
    %149 = vector.extract_strided_slice %141 {offsets = [0, 64], sizes = [8, 32], strides = [1, 1]} : vector<8x96xf32> to vector<8x32xf32>
    %150 = math.tanh %148 : vector<8x32xf32>
    %151 = arith.mulf %149, %150 : vector<8x32xf32>
    %c0_21 = arith.constant 0 : index
    %c0_22 = arith.constant 0 : index
    %152 = vector.load %arg4[%c0_21, %c0_22] : memref<32x128xf32, #tpu.memory_space<vmem>>, vector<32x128xf32>
    %cst_23 = arith.constant dense<0.000000e+00> : vector<8x128xf32>
    %153 = tpu.matmul %151, %152, %cst_23 {dimension_numbers = #tpu.dot_dimension_numbers<[1], [0], [0], [1], [0, 0, 1, 1], [], []>} : vector<8x32xf32>, vector<32x128xf32>, vector<8x128xf32> -> vector<8x128xf32>
    %c0_24 = arith.constant 0 : index
    %c0_25 = arith.constant 0 : index
    %154 = vector.load %arg5[%c0_24, %c0_25] : memref<1x128xf32, #tpu.memory_space<vmem>>, vector<1x128xf32>
    %155 = vector.broadcast %154 : vector<1x128xf32> to vector<8x128xf32>
    %156 = arith.addf %153, %155 : vector<8x128xf32>
    %cst_26 = arith.constant 0.00999999977 : f32
    %157 = vector.broadcast %cst_26 : f32 to vector<8x128xf32>
    %158 = arith.mulf %157, %156 : vector<8x128xf32>
    %159 = arith.maximumf %156, %158 : vector<8x128xf32>
    %c0_27 = arith.constant 0 : index
    %c0_28 = arith.constant 0 : index
    %160 = vector.load %arg6[%c0_27, %c0_28] : memref<128x128xf32, #tpu.memory_space<vmem>>, vector<128x128xf32>
    %cst_29 = arith.constant dense<0.000000e+00> : vector<8x128xf32>
    %161 = tpu.matmul %159, %160, %cst_29 {dimension_numbers = #tpu.dot_dimension_numbers<[1], [0], [0], [1], [0, 0, 1, 1], [], []>} : vector<8x128xf32>, vector<128x128xf32>, vector<8x128xf32> -> vector<8x128xf32>
    %c0_30 = arith.constant 0 : index
    %c0_31 = arith.constant 0 : index
    %162 = vector.load %arg7[%c0_30, %c0_31] : memref<1x128xf32, #tpu.memory_space<vmem>>, vector<1x128xf32>
    %163 = vector.broadcast %162 : vector<1x128xf32> to vector<8x128xf32>
    %164 = arith.addf %161, %163 : vector<8x128xf32>
    %165 = tpu.iota {dimensions = array<i32: 1>} : vector<8x128xi32>
    %c6_i32 = arith.constant 6 : i32
    %166 = vector.broadcast %c6_i32 : i32 to vector<8x128xi32>
    %167 = arith.cmpi slt, %165, %166 : vector<8x128xi32>
    %cst_32 = arith.constant -1.000000e+30 : f32
    %168 = vector.broadcast %cst_32 : f32 to vector<8x128xf32>
    %169 = arith.select %167, %164, %168 : vector<8x128xi1>, vector<8x128xf32>
    %cst_33 = arith.constant dense<0xFF800000> : vector<8xf32>
    %170 = vector.multi_reduction <maximumf>, %169, %cst_33 [1] : vector<8x128xf32> to vector<8xf32>
    %171 = vector.shape_cast %170 : vector<8xf32> to vector<8x1xf32>
    %172 = vector.broadcast %171 : vector<8x1xf32> to vector<8x128xf32>
    %173 = arith.subf %169, %172 : vector<8x128xf32>
    %174 = math.exp %173 : vector<8x128xf32>
    %cst_34 = arith.constant 0.000000e+00 : f32
    %175 = vector.broadcast %cst_34 : f32 to vector<8x128xf32>
    %176 = arith.select %167, %174, %175 : vector<8x128xi1>, vector<8x128xf32>
    %cst_35 = arith.constant dense<0.000000e+00> : vector<8xf32>
    %177 = vector.multi_reduction <add>, %176, %cst_35 [1] : vector<8x128xf32> to vector<8xf32>
    %178 = vector.shape_cast %177 : vector<8xf32> to vector<8x1xf32>
    %179 = math.log %178 : vector<8x1xf32>
    %180 = vector.broadcast %179 : vector<8x1xf32> to vector<8x128xf32>
    %181 = arith.subf %173, %180 : vector<8x128xf32>
    %c0_36 = arith.constant 0 : index
    %c0_37 = arith.constant 0 : index
    %182 = vector.load %arg8[%c0_36, %c0_37] : memref<8x128xf32, #tpu.memory_space<vmem>>, vector<8x128xf32>
    tpu.vector_store %arg8[%c0_36, %c0_37], %181 {strides = array<i32>} : memref<8x128xf32, #tpu.memory_space<vmem>>, vector<8x128xf32>,
    return
  }
  func.func @transform_0(%arg0: i32) -> (i32, i32, i32) {
    %c0_i32 = arith.constant 0 : i32
    %c0_i32_0 = arith.constant 0 : i32
    %c0_i32_1 = arith.constant 0 : i32
    return %c0_i32, %arg0, %c0_i32_0 : i32, i32, i32
  }
  func.func @transform_1(%arg0: i32) -> (i32, i32) {
    %c0_i32 = arith.constant 0 : i32
    %c0_i32_0 = arith.constant 0 : i32
    %c0_i32_1 = arith.constant 0 : i32
    return %c0_i32, %c0_i32_0 : i32, i32
  }
  func.func @transform_2(%arg0: i32) -> (i32, i32) {
    %c0_i32 = arith.constant 0 : i32
    %c0_i32_0 = arith.constant 0 : i32
    %c0_i32_1 = arith.constant 0 : i32
    return %c0_i32, %c0_i32_0 : i32, i32
  }
  func.func @transform_3(%arg0: i32) -> (i32, i32) {
    %c0_i32 = arith.constant 0 : i32
    %c0_i32_0 = arith.constant 0 : i32
    %c0_i32_1 = arith.constant 0 : i32
    return %c0_i32, %c0_i32_0 : i32, i32
  }
  func.func @transform_4(%arg0: i32) -> (i32, i32) {
    %c0_i32 = arith.constant 0 : i32
    %c0_i32_0 = arith.constant 0 : i32
    %c0_i32_1 = arith.constant 0 : i32
    return %c0_i32, %c0_i32_0 : i32, i32
  }
  func.func @transform_5(%arg0: i32) -> (i32, i32) {
    %c0_i32 = arith.constant 0 : i32
    %c0_i32_0 = arith.constant 0 : i32
    %c0_i32_1 = arith.constant 0 : i32
    return %c0_i32, %c0_i32_0 : i32, i32
  }
  func.func @transform_6(%arg0: i32) -> (i32, i32) {
    %c0_i32 = arith.constant 0 : i32
    %c0_i32_0 = arith.constant 0 : i32
    %c0_i32_1 = arith.constant 0 : i32
    return %c0_i32, %c0_i32_0 : i32, i32
  }
  func.func @transform_7(%arg0: i32) -> (i32, i32) {
    %c0_i32 = arith.constant 0 : i32
    %c0_i32_0 = arith.constant 0 : i32
    return %arg0, %c0_i32 : i32, i32
  }
}

</mosaic_0001>

<bundles_post_ra>
// kernel: tpu_custom_call.1
= control target key start
LH: loop header
LB: loop body
LE: loop exit
PB: predicated region body
PF: predicated region fallthrough
CT: control target
= control target key end

     0   :  { %12 = vsyncpa [#allocation3], 0  ;;  %s2000_s0 = inlined_call_operand.hbm [shape: f32[8,8,21], index: 0, kind: input, shape index: {}]   ;;  %s2001_s1 = inlined_call_operand.hbm [shape: f32[21,128], index: 1, kind: input, shape index: {}]   ;;  %s2002_s2 = inlined_call_operand.hbm [shape: f32[32,128], index: 2, kind: input, shape index: {}]   ;;  %s2003_s3 = inlined_call_operand.hbm [shape: f32[32,128], index: 3, kind: input, shape index: {}]   ;;  %s2004_s4 = inlined_call_operand.vmem [shape: f32[1,128], index: 4, kind: input, shape index: {}]   ;;  %s2005_s5 = inlined_call_operand.hbm [shape: f32[128,128], index: 5, kind: input, shape index: {}]   ;;  %s2006_s6 = inlined_call_operand.vmem [shape: f32[1,128], index: 6, kind: input, shape index: {}]   ;;  %s2007_s7 = inlined_call_operand.hbm [shape: f32[8,128], index: 7, kind: output, shape index: {}]  }
   0x1   :  { %13 = vsyncpa [#allocation6], 0 }
   0x2   :  { %14 = vsyncpa [#allocation9], 0 }
   0x3   :  { %15 = vsyncpa [#allocation4], 0  ;;  %s1714_s24 = smov [#allocation5]   ;;  %s1715_s26 = smov [#allocation8]  }
   0x4   :  { %s33_s25 = sshll.u32 %s1714_s24, 4  ;;  %s57_s27 = sshll.u32 %s1715_s26, 4  ;;  %s34_s25 = int_to_ptr.vmem [resolvable:$true] %s33_s25  ;;  %s1767_s27 = int_to_ptr.vmem [resolvable:$true] %s57_s27 }
   0x5   :  { %s1574_s30 = scalar_lea.hbm %s2001_s1, 384 }
   0x6   :  { %p1575_p0 = scmp.ne.s32.totalorder %s2001_s1, %s1574_s30  ;;  %p1578_p1 = scmp.lt.u32.totalorder %s1574_s30, %s2001_s1 }
   0x8   :  { %p1580_p2 = pnand %p1578_p1, %p1575_p0 }
   0xa   :  { %1583 = shalt.err (!%p1580_p2)
}
   0xb   :  { %s1584_s12 = scalar_lea.vmem %s34_s25, 384  ;;  %p1589_p4 = scmp.lt.s32.totalorder %s34_s25, %s34_s25 }
   0xc   :  { %p1585_p3 = scmp.ne.s32.totalorder %s34_s25, %s1584_s12  ;;  %p1590_p5 = scmp.lt.s32.totalorder %s1584_s12, %s1584_s12 }
   0xe   :  { %p1591_p6 = por %p1590_p5, %p1589_p4 }
  0x10   :  { %p1592_p7 = pnand %p1591_p6, %p1585_p3 }
  0x12   :  { %1595 = shalt.err (!%p1592_p7)
}
  0x13   :  { %s1716_s13 = smov 128   ;;  %s1717_s14 = smov 8  }
  0x14   :  { %39 = dma.hbm_to_vmem [thread:$0]  %s2001_s1, 384, %s34_s25, [#allocation6], %s1716_s13, %s1716_s13, %s1717_s14  }
  0x15   :  { %s1596_s19 = scalar_lea.hbm %s2003_s3, 512 }
  0x16   :  { %p1597_p8 = scmp.ne.s32.totalorder %s2003_s3, %s1596_s19  ;;  %p1600_p9 = scmp.lt.u32.totalorder %s1596_s19, %s2003_s3 }
  0x18   :  { %p1602_p10 = pnand %p1600_p9, %p1597_p8 }
  0x1a   :  { %1605 = shalt.err (!%p1602_p10)
}
  0x1b   :  { %s1606_s24 = scalar_lea.vmem %s1767_s27, 512  ;;  %p1611_p12 = scmp.lt.s32.totalorder %s1767_s27, %s1767_s27 }
  0x1c   :  { %p1607_p11 = scmp.ne.s32.totalorder %s1767_s27, %s1606_s24  ;;  %p1612_p13 = scmp.lt.s32.totalorder %s1606_s24, %s1606_s24 }
  0x1e   :  { %p1613_p0 = por %p1612_p13, %p1611_p12 }
  0x20   :  { %p1614_p1 = pnand %p1613_p0, %p1607_p11 }
  0x22   :  { %1617 = shalt.err (!%p1614_p1)
}
  0x23   :  { %63 = dma.hbm_to_vmem [thread:$0]  %s2003_s3, 512, %s1767_s27, [#allocation9], %s1716_s13, %s1716_s13, %s1717_s14  }
  0x24   :  { %s1718_s26 = smov [#allocation2]   ;;  %s1719_s29 = smov [#allocation7]  }
  0x25   :  { %s21_s28 = sshll.u32 %s1718_s26, 4  ;;  %s45_s30 = sshll.u32 %s1719_s29, 4  ;;  %s22_s28 = int_to_ptr.vmem [resolvable:$true] %s21_s28  ;;  %s1804_s30 = int_to_ptr.vmem [resolvable:$true] %s45_s30 }
  0x26   :  { %s1618_s10 = scalar_lea.hbm %s2000_s0, 1024 }
  0x27   :  { %p1619_p2 = scmp.ne.s32.totalorder %s2000_s0, %s1618_s10  ;;  %p1622_p3 = scmp.lt.u32.totalorder %s1618_s10, %s2000_s0 }
  0x29   :  { %p1624_p4 = pnand %p1622_p3, %p1619_p2 }
  0x2b   :  { %1627 = shalt.err (!%p1624_p4)
}
  0x2c   :  { %s1628_s3 = scalar_lea.vmem %s22_s28, 1024  ;;  %p1633_p6 = scmp.lt.s32.totalorder %s22_s28, %s22_s28 }
  0x2d   :  { %p1629_p5 = scmp.ne.s32.totalorder %s22_s28, %s1628_s3  ;;  %p1634_p7 = scmp.lt.s32.totalorder %s1628_s3, %s1628_s3 }
  0x2f   :  { %p1635_p8 = por %p1634_p7, %p1633_p6 }
  0x31   :  { %p1636_p9 = pnand %p1635_p8, %p1629_p5 }
  0x33   :  { %1639 = shalt.err (!%p1636_p9)
}
  0x34   :  { %27 = dma.hbm_to_vmem [thread:$0]  %s2000_s0, 1024, %s22_s28, [#allocation3], %s1716_s13, %s1716_s13, %s1717_s14  }
  0x35   :  { %s1640_s20 = scalar_lea.hbm %s2002_s2, 512 }
  0x36   :  { %p1641_p10 = scmp.ne.s32.totalorder %s2002_s2, %s1640_s20  ;;  %p1644_p11 = scmp.lt.u32.totalorder %s1640_s20, %s2002_s2 }
  0x38   :  { %p1646_p12 = pnand %p1644_p11, %p1641_p10 }
  0x3a   :  { %1649 = shalt.err (!%p1646_p12)
}
  0x3b   :  { %s1650_s1 = scalar_lea.vmem %s1804_s30, 512  ;;  %p1655_p0 = scmp.lt.s32.totalorder %s1804_s30, %s1804_s30 }
  0x3c   :  { %p1651_p13 = scmp.ne.s32.totalorder %s1804_s30, %s1650_s1  ;;  %p1656_p1 = scmp.lt.s32.totalorder %s1650_s1, %s1650_s1 }
  0x3e   :  { %p1657_p2 = por %p1656_p1, %p1655_p0 }
  0x40   :  { %p1658_p3 = pnand %p1657_p2, %p1651_p13 }
  0x42   :  { %1661 = shalt.err (!%p1658_p3)
}
  0x43   :  { %51 = dma.hbm_to_vmem [thread:$0]  %s2002_s2, 512, %s1804_s30, [#allocation6], %s1716_s13, %s1716_s13, %s1717_s14  }
  0x44   :  { %s1720_s26 = smov [#allocation10]   ;;  %s1662_s9 = scalar_lea.hbm %s2005_s5, 2048 }
  0x45   :  { %s71_s28 = sshll.u32 %s1720_s26, 4  ;;  %p1663_p4 = scmp.ne.s32.totalorder %s2005_s5, %s1662_s9  ;;  %s72_s28 = int_to_ptr.vmem [resolvable:$true] %s71_s28 }
  0x46   :  { %p1666_p5 = scmp.lt.u32.totalorder %s1662_s9, %s2005_s5 }
  0x48   :  { %p1668_p6 = pnand %p1666_p5, %p1663_p4 }
  0x4a   :  { %1671 = shalt.err (!%p1668_p6)
}
  0x4b   :  { %s1672_s16 = scalar_lea.vmem %s72_s28, 2048  ;;  %p1677_p8 = scmp.lt.s32.totalorder %s72_s28, %s72_s28 }
  0x4c   :  { %p1673_p7 = scmp.ne.s32.totalorder %s72_s28, %s1672_s16  ;;  %p1678_p9 = scmp.lt.s32.totalorder %s1672_s16, %s1672_s16 }
  0x4e   :  { %p1679_p10 = por %p1678_p9, %p1677_p8 }
  0x50   :  { %p1680_p11 = pnand %p1679_p10, %p1673_p7 }
  0x52   :  { %1683 = shalt.err (!%p1680_p11)
}
  0x53   :  { %77 = dma.hbm_to_vmem [thread:$0]  %s2005_s5, 2048, %s72_s28, [#allocation9], %s1716_s13, %s1716_s13, %s1717_s14  }
  0x54   :  { %1706 = dma.done.wait [#allocation3], 1024  }
  0x55   :  { %1707 = vsyncadd [#allocation3], 4294966272 }
  0x56   :  { %1708 = dma.done.wait [#allocation6], 896  }
  0x57   :  { %1709 = vsyncadd [#allocation6], 4294966400 }
  0x58   :  { %1710 = dma.done.wait [#allocation9], 2560  }
  0x59   :  { %1711 = vsyncadd [#allocation9], 4294964736  ;;  %vm106_vm0 = vcmask 171008   ;;  %v103_v0 = vld [vmem:[#allocation5] sm:$0xff]  ;;  %v104_v1 = vld [vmem:[#allocation5 + $0x8] sm:$0xff]  ;;  %vm131_vm1 = vcmask 1044480  }
  0x5a   :  { %v1417_v2 = vpack.c.bf16 %v104_v1, %v103_v0  ;;  %v95_v3 = vld [vmem:[#allocation2] sm:$0xff]  ;;  %v105_v4 = vld [vmem:[#allocation5 + $0x10] sm:$0x1f]  ;;  %v96_v5 = vld [vmem:[#allocation2 + $0x8] sm:$0xff]  ;;  %s1721_s5 = smov 32   ;;  %v1722_v18 = vmov 0.0|0.0  }
  0x5b   :  { %1282 = vmatprep.mubr.msk.f32.mxu1 %vm106_vm0, %v95_v3  ;;  %v240_v15 = vld [vmem:[#allocation7] sm:$0xff]  ;;  %v241_v16 = vld [vmem:[#allocation7 + $0x8] sm:$0xff]  ;;  %v97_v17 = vld [vmem:[#allocation2 + $0x10] sm:$0xff]  ;;  %1433 = vmatprep.subr.bf16.mxu0 %v1722_v18  ;;  %vm1723_vm2 = vmmov 0   ;;  %v1724_v27 = vmov 0.0   ;;  %s1725_s13 = smov 64  }
  0x5c   :  { %1418 = vmatprep.subr.bf16.mxu1 %v1417_v2  ;;  %v1862_v19 = vpack.c.bf16 %v241_v16, %v240_v15  ;;  %v98_v20 = vld [vmem:[#allocation2 + $0x18] sm:$0xff]  ;;  %v99_v21 = vld [vmem:[#allocation2 + $0x20] sm:$0xff]  ;;  %v242_v22 = vld [vmem:[#allocation7 + $0x10] sm:$0xff]  ;;  %1324 = vmatprep.mubr.msk.f32.mxu0 %vm1723_vm2, %v1724_v27  ;;  %vm265_vm3 = vcmask 261120  }
  0x5d   :  { %1420 = vmatpush3.bf16.msra.mxu1 %v1417_v2  ;;  %v243_v23 = vld [vmem:[#allocation7 + $0x18] sm:$0xff]  ;;  %v100_v24 = vld [vmem:[#allocation2 + $0x28] sm:$0xff]  ;;  %v102_v28 = vld [vmem:[#allocation2 + $0x38] sm:$0xff] }
  0x5e   :  { %1280 = vmatprep.subr.msk.mxu1 %vm131_vm1, %v105_v4  ;;  %v1869_v25 = vpack.c.bf16 %v243_v23, %v242_v22  ;;  %v101_v26 = vld [vmem:[#allocation2 + $0x30] sm:$0xff]  ;;  %1435 = vmatpush3.bf16.msra.mxu0 %v1862_v19 }
  0x5f   :  { %1436 = vmatprep.subr.bf16.mxu0 %v1722_v18 }
  0x61   :  { %1281 = vmatpush3.msk.msra.mxu1 %vm131_vm1, %v105_v4 }
  0x62   :  { %1283 = vmatmul.mubr.msk.f32.vlgmr.msra.gmra.mrb[0].mxu1 %vm106_vm0, %v96_v5  ;;  %1421 = vmatprep.subr.bf16.mxu1 %v1722_v18 }
  0x63   :  { %1285 = vmatprep.mubr.msk.f32.mxu1 %vm106_vm0, %v97_v17  ;;  %1423 = vmatpush3.bf16.msra.mxu1 %v1862_v19 }
  0x64   :  { %1424 = vmatprep.subr.bf16.mxu1 %v1722_v18  ;;  %1438 = vmatpush3.bf16.msra.mxu0 %v1869_v25 }
  0x65   :  { %1445 = vmatprep.subr.bf16.mxu0 %v1722_v18 }
  0x66   :  { %1286 = vmatmul.mubr.msk.f32.gmra.mrb[2].mxu1 %vm106_vm0, %v98_v20 }
  0x67   :  { %1288 = vmatprep.mubr.msk.f32.mxu1 %vm106_vm0, %v99_v21  ;;  %1426 = vmatpush3.bf16.msra.mxu1 %v1869_v25 }
  0x68   :  { %1427 = vmatprep.subr.bf16.mxu1 %v1722_v18 }
  0x6a   :  { %1289 = vmatmul.mubr.msk.f32.gmra.mrb[4].mxu1 %vm106_vm0, %v100_v24 }
  0x6b   :  { %1291 = vmatprep.mubr.msk.f32.mxu1 %vm106_vm0, %v101_v26 }
  0x6e   :  { %1292 = vmatmul.mubr.msk.f32.gmra.mrb[6].mxu1 %vm106_vm0, %v102_v28 }
  0x6f   :  { %1302 = vmatprep.mubr.msk.f32.mxu1 %vm1723_vm2, %v1724_v27 }
 0x135   :  { %v1858_v6 = vpop.f32.mrb[0].mxu1 }
 0x136   :  { %v201_v7 = vpop.f32.mrb[1].mxu1 }
 0x137   :  { %1506 = vtanh.f32 %v201_v7  ;;  %v1190_v9 = vmul.f32 -1.442695, %v201_v7 }
 0x139   :  { %1508 = vpow2.f32 %v1190_v9  ;;  %v1888_v32 = vpop.f32.mrb[2].mxu1 }
 0x13a   :  { %v211_v33 = vpop.f32.mrb[3].mxu1 }
 0x13d   :  { %v1890_v34 = vpop.f32.mrb[4].mxu1 }
 0x13e   :  { %v1892_v35 = vpop.f32.mrb[5].mxu1 }
 0x141   :  { %v1507_v8 = vpop.eup %1506  ;;  %v1894_v36 = vpop.f32.mrb[6].mxu1 }
 0x142   :  { %252 = vrot.lane.b32.xlu0 %v1507_v8, %s1721_s5  ;;  %v1896_v37 = vpop.f32.mrb[7].mxu1 }
 0x143   :  { %v1509_v10 = vpop.eup %1508 }
 0x144   :  { %v247_v11 = vadd.f32 1.0, %v1509_v10 }
 0x146   :  { %1510 = vrcp.f32 %v247_v11 }
 0x150   :  { %v1511_v12 = vpop.eup %1510 }
 0x1b4   :  { %v253_v13 = vpop.permute.xlu0 %252 }
 0x1b5   :  { %v255_v14 = vmul.f32 %v1511_v12, %v253_v13 }
 0x1b7   :  { %1512 = vtanh.f32 %v255_v14 }
 0x1c1   :  { %v1513_v29 = vpop.eup %1512 }
 0x1c2   :  { %258 = vrot.lane.b32.xlu0 %v1513_v29, %s1725_s13 }
 0x1c6   :  { %347 = vrot.lane.b32.xlu0 %v255_v14, %s1721_s5 }
 0x234   :  { %v259_v30 = vpop.permute.xlu0 %258 }
 0x235   :  { %v261_v31 = vmul.f32 %v1511_v12, %v259_v30 }
 0x237   :  { %263 = vrot.lane.b32.xlu1 %v261_v31, %s1725_s13 }
 0x238   :  { %v348_v49 = vpop.permute.xlu0 %347 }
 0x2a9   :  { %v264_v38 = vpop.permute.xlu1 %263 }
 0x2aa   :  { %1303 = vmatmul.mubr.msk.f32.vlgmr.msra.gmra.mrb[8].mxu1 %vm265_vm3, %v264_v38 }
 0x2ab   :  { %1429 = vmatpush3.bf16.msra.mxu1 %v1862_v19  ;;  %1313 = vmatprep.mubr.msk.f32.mxu1 %vm1723_vm2, %v1724_v27 }
 0x2ac   :  { %1430 = vmatprep.subr.bf16.mxu1 %v1722_v18 }
 0x2af   :  { %1432 = vmatpush3.bf16.msra.mxu1 %v1869_v25 }
 0x2b0   :  { %1439 = vmatprep.subr.bf16.mxu1 %v1722_v18 }
 0x37d   :  { %v334_v39 = vpop.f32.mrb[8].mxu1 }
 0x37e   :  { %v338_v40 = vadd.f32 %v1858_v6, %v334_v39  ;;  %v1304_v41 = vpop.f32.mrb[9].mxu1 }
 0x380   :  { %1514 = vtanh.f32 %v338_v40  ;;  %v1192_v43 = vmul.f32 -1.442695, %v338_v40 }
 0x382   :  { %1516 = vpow2.f32 %v1192_v43 }
 0x38a   :  { %v1515_v42 = vpop.eup %1514 }
 0x38b   :  { %352 = vrot.lane.b32.xlu1 %v1515_v42, %s1721_s5 }
 0x38c   :  { %v1517_v44 = vpop.eup %1516 }
 0x38d   :  { %v342_v45 = vadd.f32 1.0, %v1517_v44 }
 0x38f   :  { %1518 = vrcp.f32 %v342_v45 }
 0x399   :  { %v1519_v46 = vpop.eup %1518 }
 0x39a   :  { %v350_v50 = vmul.f32 %v1519_v46, %v348_v49 }
 0x3fd   :  { %v353_v47 = vpop.permute.xlu1 %352 }
 0x3fe   :  { %v355_v48 = vmul.f32 %v1519_v46, %v353_v47 }
 0x400   :  { %357 = vrot.lane.b32.xlu1 %v355_v48, %s1721_s5 }
 0x472   :  { %v358_v51 = vpop.permute.xlu1 %357 }
 0x473   :  { %v360_v52 = vadd.f32 %v358_v51, %v350_v50 }
 0x475   :  { %1520 = vtanh.f32 %v360_v52 }
 0x47f   :  { %v1521_v53 = vpop.eup %1520 }
 0x480   :  { %363 = vrot.lane.b32.xlu0 %v1521_v53, %s1721_s5 }
 0x4f2   :  { %v364_v54 = vpop.permute.xlu0 %363 }
 0x4f3   :  { %v366_v55 = vmul.f32 %v1519_v46, %v364_v54 }
 0x4f5   :  { %368 = vrot.lane.b32.xlu1 %v366_v55, %s1725_s13 }
 0x567   :  { %v369_v56 = vpop.permute.xlu1 %368 }
 0x568   :  { %1314 = vmatmul.mubr.msk.f32.vlgmr.msra.gmra.mrb[10].mxu1 %vm265_vm3, %v369_v56 }
 0x569   :  { %1441 = vmatpush3.bf16.msra.mxu1 %v1862_v19  ;;  %1335 = vmatprep.mubr.msk.f32.mxu1 %vm1723_vm2, %v1724_v27 }
 0x56a   :  { %1442 = vmatprep.subr.bf16.mxu1 %v1722_v18 }
 0x56d   :  { %1444 = vmatpush3.bf16.msra.mxu1 %v1869_v25 }
 0x56e   :  { %1451 = vmatprep.subr.bf16.mxu1 %v1722_v18 }
 0x63b   :  { %v438_v57 = vpop.f32.mrb[10].mxu1 }
 0x63c   :  { %v442_v58 = vadd.f32 %v438_v57, %v211_v33  ;;  %v1315_v59 = vpop.f32.mrb[11].mxu1 }
 0x63e   :  { %1522 = vtanh.f32 %v442_v58  ;;  %v1194_v61 = vmul.f32 -1.442695, %v442_v58 }
 0x640   :  { %1524 = vpow2.f32 %v1194_v61 }
 0x648   :  { %v1523_v60 = vpop.eup %1522 }
 0x649   :  { %452 = vrot.lane.b32.xlu0 %v1523_v60, %s1721_s5 }
 0x64a   :  { %v1525_v62 = vpop.eup %1524 }
 0x64b   :  { %v446_v63 = vadd.f32 1.0, %v1525_v62 }
 0x64d   :  { %1526 = vrcp.f32 %v446_v63 }
 0x657   :  { %v1527_v0 = vpop.eup %1526 }
 0x658   :  { %v450_v3 = vmul.f32 %v1527_v0, %v360_v52 }
 0x6bb   :  { %v453_v1 = vpop.permute.xlu0 %452 }
 0x6bc   :  { %v455_v2 = vmul.f32 %v1527_v0, %v453_v1 }
 0x6be   :  { %457 = vrot.lane.b32.xlu1 %v455_v2, %s1721_s5 }
 0x730   :  { %v458_v4 = vpop.permute.xlu1 %457 }
 0x731   :  { %v460_v5 = vadd.f32 %v458_v4, %v450_v3 }
 0x733   :  { %1528 = vtanh.f32 %v460_v5 }
 0x73d   :  { %v1529_v6 = vpop.eup %1528 }
 0x73e   :  { %463 = vrot.lane.b32.xlu0 %v1529_v6, %s1721_s5 }
 0x7b0   :  { %v464_v7 = vpop.permute.xlu0 %463 }
 0x7b1   :  { %v466_v8 = vmul.f32 %v1527_v0, %v464_v7 }
 0x7b3   :  { %468 = vrot.lane.b32.xlu1 %v466_v8, %s1725_s13 }
 0x825   :  { %v469_v9 = vpop.permute.xlu1 %468 }
 0x826   :  { %1325 = vmatmul.mubr.msk.f32.vlgmr.msra.gmra.mrb[0].mxu0 %vm265_vm3, %v469_v9 }
 0x827   :  { %1447 = vmatpush3.bf16.msra.mxu0 %v1862_v19  ;;  %1346 = vmatprep.mubr.msk.f32.mxu0 %vm1723_vm2, %v1724_v27 }
 0x828   :  { %1448 = vmatprep.subr.bf16.mxu0 %v1722_v18 }
 0x82b   :  { %1450 = vmatpush3.bf16.msra.mxu0 %v1869_v25 }
 0x82c   :  { %1457 = vmatprep.subr.bf16.mxu0 %v1722_v18 }
 0x8f9   :  { %v538_v10 = vpop.f32.mrb[0].mxu0 }
 0x8fa   :  { %v542_v11 = vadd.f32 %v1888_v32, %v538_v10  ;;  %v1326_v12 = vpop.f32.mrb[1].mxu0 }
 0x8fc   :  { %1530 = vtanh.f32 %v542_v11  ;;  %v1196_v14 = vmul.f32 -1.442695, %v542_v11 }
 0x8fe   :  { %1532 = vpow2.f32 %v1196_v14 }
 0x906   :  { %v1531_v13 = vpop.eup %1530 }
 0x907   :  { %552 = vrot.lane.b32.xlu0 %v1531_v13, %s1721_s5 }
 0x908   :  { %v1533_v15 = vpop.eup %1532 }
 0x909   :  { %v546_v16 = vadd.f32 1.0, %v1533_v15 }
 0x90b   :  { %1534 = vrcp.f32 %v546_v16 }
 0x915   :  { %v1535_v17 = vpop.eup %1534 }
 0x916   :  { %v550_v22 = vmul.f32 %v1535_v17, %v460_v5 }
 0x979   :  { %v553_v20 = vpop.permute.xlu0 %552 }
 0x97a   :  { %v555_v21 = vmul.f32 %v1535_v17, %v553_v20 }
 0x97c   :  { %557 = vrot.lane.b32.xlu1 %v555_v21, %s1721_s5 }
 0x9ee   :  { %v558_v23 = vpop.permute.xlu1 %557 }
 0x9ef   :  { %v560_v24 = vadd.f32 %v558_v23, %v550_v22 }
 0x9f1   :  { %1536 = vtanh.f32 %v560_v24 }
 0x9fb   :  { %v1537_v26 = vpop.eup %1536 }
 0x9fc   :  { %563 = vrot.lane.b32.xlu0 %v1537_v26, %s1721_s5 }
 0xa6e   :  { %v564_v28 = vpop.permute.xlu0 %563 }
 0xa6f   :  { %v566_v29 = vmul.f32 %v1535_v17, %v564_v28 }
 0xa71   :  { %568 = vrot.lane.b32.xlu1 %v566_v29, %s1725_s13 }
 0xae3   :  { %v569_v30 = vpop.permute.xlu1 %568 }
 0xae4   :  { %1336 = vmatmul.mubr.msk.f32.vlgmr.msra.gmra.mrb[12].mxu1 %vm265_vm3, %v569_v30 }
 0xae5   :  { %1453 = vmatpush3.bf16.msra.mxu1 %v1862_v19  ;;  %1357 = vmatprep.mubr.msk.f32.mxu1 %vm1723_vm2, %v1724_v27 }
 0xae6   :  { %1454 = vmatprep.subr.bf16.mxu1 %v1722_v18 }
 0xae9   :  { %1456 = vmatpush3.bf16.msra.mxu1 %v1869_v25 }
 0xaea   :  { %1463 = vmatprep.subr.bf16.mxu1 %v1722_v18 }
 0xbb7   :  { %v638_v31 = vpop.f32.mrb[12].mxu1 }
 0xbb8   :  { %v642_v32 = vadd.f32 %v638_v31, %v1892_v35  ;;  %v1337_v33 = vpop.f32.mrb[13].mxu1 }
 0xbb9   :  { %v968_v33 = vld [vmem:[#allocation8 + $0x8] sm:$0xff] }
 0xbba   :  { %1538 = vtanh.f32 %v642_v32  ;;  %v1198_v39 = vmul.f32 -1.442695, %v642_v32 }
 0xbbc   :  { %1540 = vpow2.f32 %v1198_v39 }
 0xbc4   :  { %v1539_v38 = vpop.eup %1538 }
 0xbc5   :  { %652 = vrot.lane.b32.xlu0 %v1539_v38, %s1721_s5  ;;  %v969_v38 = vld [vmem:[#allocation8 + $0x10] sm:$0xff] }
 0xbc6   :  { %v1541_v40 = vpop.eup %1540 }
 0xbc7   :  { %v646_v41 = vadd.f32 1.0, %v1541_v40  ;;  %v970_v40 = vld [vmem:[#allocation8 + $0x18] sm:$0xff] }
 0xbc9   :  { %1542 = vrcp.f32 %v646_v41  ;;  %v1467_v41 = vpack.c.bf16 %v970_v40, %v969_v38 }
 0xbd3   :  { %v1543_v42 = vpop.eup %1542 }
 0xbd4   :  { %v650_v45 = vmul.f32 %v1543_v42, %v560_v24 }
 0xc37   :  { %v653_v43 = vpop.permute.xlu0 %652 }
 0xc38   :  { %v655_v44 = vmul.f32 %v1543_v42, %v653_v43  ;;  %v1055_v43 = vld [vmem:[#allocation10] sm:$0xff] }
 0xc3a   :  { %657 = vrot.lane.b32.xlu1 %v655_v44, %s1721_s5  ;;  %v1056_v44 = vld [vmem:[#allocation10 + $0x8] sm:$0xff] }
 0xcac   :  { %v658_v46 = vpop.permute.xlu1 %657 }
 0xcad   :  { %v660_v47 = vadd.f32 %v658_v46, %v650_v45  ;;  %v1057_v45 = vld [vmem:[#allocation10 + $0x10] sm:$0xff]  ;;  %v1470_v46 = vpack.c.bf16 %v1056_v44, %v1055_v43 }
 0xcaf   :  { %1544 = vtanh.f32 %v660_v47 }
 0xcb9   :  { %v1545_v35 = vpop.eup %1544 }
 0xcba   :  { %663 = vrot.lane.b32.xlu0 %v1545_v35, %s1721_s5 }
 0xd2c   :  { %v664_v48 = vpop.permute.xlu0 %663 }
 0xd2d   :  { %v666_v49 = vmul.f32 %v1543_v42, %v664_v48  ;;  %v1059_v48 = vld [vmem:[#allocation10 + $0x20] sm:$0xff] }
 0xd2f   :  { %668 = vrot.lane.b32.xlu1 %v666_v49, %s1725_s13  ;;  %v1060_v49 = vld [vmem:[#allocation10 + $0x28] sm:$0xff] }
 0xda1   :  { %v669_v50 = vpop.permute.xlu1 %668 }
 0xda2   :  { %1347 = vmatmul.mubr.msk.f32.vlgmr.msra.gmra.mrb[2].mxu0 %vm265_vm3, %v669_v50  ;;  %v1476_v50 = vpack.c.bf16 %v1060_v49, %v1059_v48 }
 0xda3   :  { %1459 = vmatpush3.bf16.msra.mxu0 %v1862_v19  ;;  %1368 = vmatprep.mubr.msk.f32.mxu0 %vm1723_vm2, %v1724_v27 }
 0xda4   :  { %1460 = vmatprep.subr.bf16.mxu0 %v1722_v18 }
 0xda7   :  { %1462 = vmatpush3.bf16.msra.mxu0 %v1869_v25 }
 0xda8   :  { %1469 = vmatprep.subr.bf16.mxu0 %v1722_v18 }
 0xe75   :  { %v738_v51 = vpop.f32.mrb[2].mxu0 }
 0xe76   :  { %v742_v52 = vadd.f32 %v1890_v34, %v738_v51  ;;  %v1348_v53 = vpop.f32.mrb[3].mxu0  ;;  %v1061_v51 = vld [vmem:[#allocation10 + $0x30] sm:$0xff] }
 0xe78   :  { %1546 = vtanh.f32 %v742_v52  ;;  %v1200_v55 = vmul.f32 -1.442695, %v742_v52  ;;  %v1062_v52 = vld [vmem:[#allocation10 + $0x38] sm:$0xff] }
 0xe7a   :  { %1548 = vpow2.f32 %v1200_v55  ;;  %v1479_v55 = vpack.c.bf16 %v1062_v52, %v1061_v51 }
 0xe82   :  { %v1547_v54 = vpop.eup %1546 }
 0xe83   :  { %752 = vrot.lane.b32.xlu0 %v1547_v54, %s1721_s5 }
 0xe84   :  { %v1549_v19 = vpop.eup %1548 }
 0xe85   :  { %v746_v56 = vadd.f32 1.0, %v1549_v19  ;;  %v1063_v19 = vld [vmem:[#allocation10 + $0x40] sm:$0xff] }
 0xe87   :  { %1550 = vrcp.f32 %v746_v56  ;;  %v1064_v56 = vld [vmem:[#allocation10 + $0x48] sm:$0xff] }
 0xe91   :  { %v1551_v57 = vpop.eup %1550 }
 0xe92   :  { %v750_v25 = vmul.f32 %v1551_v57, %v660_v47  ;;  %v1058_v47 = vld [vmem:[#allocation10 + $0x18] sm:$0xff] }
 0xe93   :  { %v1473_v35 = vpack.c.bf16 %v1058_v47, %v1057_v45 }
 0xef5   :  { %v753_v58 = vpop.permute.xlu0 %752 }
 0xef6   :  { %v755_v59 = vmul.f32 %v1551_v57, %v753_v58  ;;  %v1065_v58 = vld [vmem:[#allocation10 + $0x50] sm:$0xff] }
 0xef8   :  { %757 = vrot.lane.b32.xlu1 %v755_v59, %s1721_s5  ;;  %v1066_v59 = vld [vmem:[#allocation10 + $0x58] sm:$0xff] }
 0xf6a   :  { %v758_v60 = vpop.permute.xlu1 %757 }
 0xf6b   :  { %v760_v61 = vadd.f32 %v758_v60, %v750_v25  ;;  %v1485_v25 = vpack.c.bf16 %v1066_v59, %v1065_v58 }
 0xf6d   :  { %1552 = vtanh.f32 %v760_v61 }
 0xf77   :  { %v1553_v34 = vpop.eup %1552 }
 0xf78   :  { %763 = vrot.lane.b32.xlu0 %v1553_v34, %s1721_s5  ;;  %v1068_v34 = vld [vmem:[#allocation10 + $0x68] sm:$0xff] }
 0xfea   :  { %v764_v62 = vpop.permute.xlu0 %763 }
 0xfeb   :  { %v766_v63 = vmul.f32 %v1551_v57, %v764_v62  ;;  %v1482_v57 = vpack.c.bf16 %v1064_v56, %v1063_v19 }
 0xfed   :  { %768 = vrot.lane.b32.xlu1 %v766_v63, %s1725_s13  ;;  %v1069_v63 = vld [vmem:[#allocation10 + $0x70] sm:$0xff] }
0x105f   :  { %v769_v0 = vpop.permute.xlu1 %768 }
0x1060   :  { %1358 = vmatmul.mubr.msk.f32.vlgmr.msra.gmra.mrb[14].mxu1 %vm265_vm3, %v769_v0  ;;  %v1070_v0 = vld [vmem:[#allocation10 + $0x78] sm:$0xff] }
0x1061   :  { %1379 = vmatprep.mubr.msk.f32.mxu1 %vm1723_vm2, %v1724_v27 }
0x1133   :  { %v838_v1 = vpop.f32.mrb[14].mxu1 }
0x1134   :  { %v842_v2 = vadd.f32 %v838_v1, %v1896_v37  ;;  %v1359_v3 = vpop.f32.mrb[15].mxu1  ;;  %v1491_v1 = vpack.c.bf16 %v1070_v0, %v1069_v63 }
0x1136   :  { %1554 = vtanh.f32 %v842_v2  ;;  %v1202_v5 = vmul.f32 -1.442695, %v842_v2  ;;  %v1205_v2 = vld [vmem:[%s2004_s4] ss:$0 sm:$0xff]  ;;  %s1726_s4 = smov [#allocation11]  }
0x1137   :  { %s1170_s18 = sshll.u32 %s1726_s4, 4  ;;  %s1171_s18 = int_to_ptr.vmem [resolvable:$true] %s1170_s18 }
0x1138   :  { %1556 = vpow2.f32 %v1202_v5  ;;  %p1689_p13 = scmp.lt.s32.totalorder %s1171_s18, %s1171_s18 }
0x1140   :  { %v1555_v4 = vpop.eup %1554 }
0x1141   :  { %852 = vrot.lane.b32.xlu0 %v1555_v4, %s1721_s5 }
0x1142   :  { %v1557_v6 = vpop.eup %1556 }
0x1143   :  { %v846_v7 = vadd.f32 1.0, %v1557_v6 }
0x1145   :  { %1558 = vrcp.f32 %v846_v7 }
0x114f   :  { %v1559_v8 = vpop.eup %1558 }
0x1150   :  { %v850_v11 = vmul.f32 %v1559_v8, %v760_v61  ;;  %v1067_v61 = vld [vmem:[#allocation10 + $0x60] sm:$0xff] }
0x1151   :  { %v1488_v62 = vpack.c.bf16 %v1068_v34, %v1067_v61 }
0x11b3   :  { %v853_v9 = vpop.permute.xlu0 %852 }
0x11b4   :  { %v855_v10 = vmul.f32 %v1559_v8, %v853_v9 }
0x11b6   :  { %857 = vrot.lane.b32.xlu1 %v855_v10, %s1721_s5 }
0x1228   :  { %v858_v12 = vpop.permute.xlu1 %857 }
0x1229   :  { %v860_v13 = vadd.f32 %v858_v12, %v850_v11 }
0x122b   :  { %1560 = vtanh.f32 %v860_v13 }
0x1235   :  { %v1561_v37 = vpop.eup %1560 }
0x1236   :  { %863 = vrot.lane.b32.xlu0 %v1561_v37, %s1721_s5 }
0x12a8   :  { %v864_v14 = vpop.permute.xlu0 %863 }
0x12a9   :  { %v866_v15 = vmul.f32 %v1559_v8, %v864_v14  ;;  %v1148_v8 = vlaneseq }
0x12ab   :  { %868 = vrot.lane.b32.xlu1 %v866_v15, %s1725_s13  ;;  %v1149_v9 = vand.u32 127, %v1148_v8 }
0x12ad   :  { %vm1150_vm4 = vcmp.lt.s32.totalorder %v1149_v9, 6 }
0x131d   :  { %v869_v16 = vpop.permute.xlu1 %868 }
0x131e   :  { %1369 = vmatmul.mubr.msk.f32.vlgmr.msra.gmra.mrb[4].mxu0 %vm265_vm3, %v869_v16 }
0x131f   :  { %1414 = vmatprep.mubr.msk.f32.mxu0 %vm1723_vm2, %v1724_v27  ;;  %1471 = vmatpush3.bf16.msra.mxu0 %v1470_v46 }
0x1320   :  { %1472 = vmatprep.subr.bf16.mxu0 %v1722_v18 }
0x1323   :  { %1474 = vmatpush3.bf16.msra.mxu0 %v1473_v35 }
0x1324   :  { %1475 = vmatprep.subr.bf16.mxu0 %v1722_v18 }
0x1327   :  { %1477 = vmatpush3.bf16.msra.mxu0 %v1476_v50 }
0x1328   :  { %1478 = vmatprep.subr.bf16.mxu0 %v1722_v18 }
0x132b   :  { %1480 = vmatpush3.bf16.msra.mxu0 %v1479_v55 }
0x132c   :  { %1481 = vmatprep.subr.bf16.mxu0 %v1722_v18 }
0x132f   :  { %1483 = vmatpush3.bf16.msra.mxu0 %v1482_v57 }
0x1330   :  { %1484 = vmatprep.subr.bf16.mxu0 %v1722_v18 }
0x1333   :  { %1486 = vmatpush3.bf16.msra.mxu0 %v1485_v25 }
0x1334   :  { %1487 = vmatprep.subr.bf16.mxu0 %v1722_v18 }
0x1337   :  { %1489 = vmatpush3.bf16.msra.mxu0 %v1488_v62 }
0x1338   :  { %1490 = vmatprep.subr.bf16.mxu0 %v1722_v18 }
0x133b   :  { %1492 = vmatpush3.bf16.msra.mxu0 %v1491_v1 }
0x13f1   :  { %v938_v17 = vpop.f32.mrb[4].mxu0 }
0x13f2   :  { %v942_v20 = vadd.f32 %v1894_v36, %v938_v17  ;;  %v1370_v21 = vpop.f32.mrb[5].mxu0  ;;  %v967_v36 = vld [vmem:[#allocation8] sm:$0xff] }
0x13f3   :  { %v1464_v39 = vpack.c.bf16 %v968_v33, %v967_v36 }
0x13f4   :  { %1562 = vtanh.f32 %v942_v20  ;;  %v1204_v23 = vmul.f32 -1.442695, %v942_v20 }
0x13f5   :  { %1465 = vmatpush3.bf16.msra.mxu1 %v1464_v39 }
0x13f6   :  { %1564 = vpow2.f32 %v1204_v23  ;;  %1466 = vmatprep.subr.bf16.mxu1 %v1722_v18  ;;  %v1207_v18 = vld [vmem:[%s2006_s6] ss:$0 sm:$0xff]  ;;  %s1684_s6 = scalar_lea.vmem %s1171_s18, 128 }
0x13f7   :  { %p1685_p12 = scmp.ne.s32.totalorder %s1171_s18, %s1684_s6  ;;  %p1690_p0 = scmp.lt.s32.totalorder %s1684_s6, %s1684_s6 }
0x13f9   :  { %1468 = vmatpush3.bf16.msra.mxu1 %v1467_v41  ;;  %p1691_p1 = por %p1690_p0, %p1689_p13 }
0x13fb   :  { %p1692_p2 = pnand %p1691_p1, %p1685_p12 }
0x13fe   :  { %v1563_v22 = vpop.eup %1562 }
0x13ff   :  { %952 = vrot.lane.b32.xlu0 %v1563_v22, %s1721_s5 }
0x1400   :  { %v1565_v24 = vpop.eup %1564 }
0x1401   :  { %v946_v26 = vadd.f32 1.0, %v1565_v24 }
0x1403   :  { %1566 = vrcp.f32 %v946_v26 }
0x140d   :  { %v1567_v28 = vpop.eup %1566 }
0x140e   :  { %v950_v31 = vmul.f32 %v1567_v28, %v860_v13 }
0x1471   :  { %v953_v29 = vpop.permute.xlu0 %952 }
0x1472   :  { %v955_v30 = vmul.f32 %v1567_v28, %v953_v29 }
0x1474   :  { %957 = vrot.lane.b32.xlu1 %v955_v30, %s1721_s5 }
0x14e6   :  { %v958_v27 = vpop.permute.xlu1 %957 }
0x14e7   :  { %v960_v32 = vadd.f32 %v958_v27, %v950_v31 }
0x14e9   :  { %1568 = vtanh.f32 %v960_v32 }
0x14f3   :  { %v1569_v42 = vpop.eup %1568 }
0x14f4   :  { %963 = vrot.lane.b32.xlu0 %v1569_v42, %s1721_s5 }
0x1566   :  { %v964_v53 = vpop.permute.xlu0 %963 }
0x1567   :  { %v966_v54 = vmul.f32 %v1567_v28, %v964_v53 }
0x1569   :  { %979 = vrot.lane.b32.xlu1 %v966_v54, %s1725_s13 }
0x15db   :  { %v980_v60 = vpop.permute.xlu1 %979 }
0x15dc   :  { %1380 = vmatmul.mubr.msk.f32.vlgmr.msra.gmra.mrb[16].mxu1 %vm265_vm3, %v980_v60 }
0x16af   :  { %v1049_v3 = vpop.f32.mrb[16].mxu1 }
0x16b0   :  { %v1050_v4 = vadd.f32 %v1205_v2, %v1049_v3  ;;  %v1381_v5 = vpop.f32.mrb[17].mxu1 }
0x16b2   :  { %v1053_v6 = vmul.f32 0.01, %v1050_v4 }
0x16b4   :  { %v1054_v7 = vmax.f32 %v1050_v4, %v1053_v6 }
0x16b6   :  { %1415 = vmatmul.mubr.f32.vlgmr.msra.gmra.mrb[6].mxu0 %v1054_v7 }
0x1789   :  { %v1144_v10 = vpop.f32.mrb[6].mxu0 }
0x178a   :  { %v1145_v11 = vadd.f32 %v1207_v18, %v1144_v10  ;;  %v1416_v12 = vpop.f32.mrb[7].mxu0 }
0x178c   :  { %v1151_v13 = vsel %vm1150_vm4, %v1145_v11, -1e+30 }
0x178d   :  { %1152 = vmax.xlane.f32.xlu0 %v1151_v13 }
0x181a   :  { %v1153_v37 = vpop.xlane.xlu0 %1152 }
0x181b   :  { %v1154_v14 = vsub.f32 %v1151_v13, %v1153_v37 }
0x181d   :  { %v1155_v15 = vmul.f32 1.442695, %v1154_v14 }
0x181f   :  { %1570 = vpow2.f32 %v1155_v15 }
0x1829   :  { %v1571_v16 = vpop.eup %1570 }
0x182a   :  { %v1157_v17 = vsel %vm1150_vm4, %v1571_v16, 0.0 }
0x182b   :  { %1158 = vadd.xlane.f32.xlu1 %v1157_v17 }
0x18b8   :  { %v1159_v20 = vpop.xlane.xlu1 %1158 }
0x18b9   :  { %1572 = vlog2.f32 %v1159_v20 }
0x18c3   :  { %v1573_v21 = vpop.eup %1572 }
0x18c4   :  { %v1161_v22 = vmul.f32 0.6931472, %v1573_v21 }
0x18c6   :  { %v1162_v23 = vsub.f32 %v1154_v14, %v1161_v22 }
0x18c8   :  { %1163 = vst [vmem:[#allocation11] sm:$0xff] %v1162_v23 }
0x18c9   :  { %1695 = shalt.err (!%p1692_p2)
}
0x18ca   :  { %s1696_s21 = scalar_lea.hbm %s2007_s7, 128 }
0x18cb   :  { %p1697_p3 = scmp.ne.s32.totalorder %s2007_s7, %s1696_s21  ;;  %p1700_p4 = scmp.lt.u32.totalorder %s1696_s21, %s2007_s7 }
0x18cd   :  { %p1702_p5 = pnand %p1700_p4, %p1697_p3 }
0x18cf   :  { %1705 = shalt.err (!%p1702_p5)
}
0x18d0   :  { %1173 = dma.vmem_to_hbm [thread:$0]  %s1171_s18, 128, %s2007_s7, [#allocation4]  }
0x18d1   :  { %1712 = dma.done.wait [#allocation4], 128  }
0x18d2   :  { %1713 = vsyncadd [#allocation4], 4294967168 }
0x18d3   :  { %1177 = vsyncpa [#allocation3], 1 }
0x18d4   :  { %1178 = vsyncpa [#allocation6], 1 }
0x18d5   :  { %1179 = vsyncpa [#allocation9], 1 }
0x18d6   :  { %1180 = vsyncpa [#allocation4], 1 }

</bundles_post_ra>
